<compile_context>
chip_gen: v7x
topology: tpu7x:2x2x1
jax: 0.10.0
libtpu: 0.0.40
codegen_flags: <defaults>
</compile_context>

<pallas_src>
import jax
import jax.numpy as jnp
from jax.experimental import pallas as pl
from jax.experimental.pallas import tpu as pltpu


def _round_up(x, m):
    return ((x + m - 1) // m) * m


def scorer_kernel(x_ref, w_ref, b_ref, out_ref):
    # x_ref:   (TM, Dp)  block of packed embedding rows (input dtype)
    # w_ref:   (Dp, G)   resident block-diagonal scorer weight (f32, untiled)
    # b_ref:   (1,)      scorer bias, f32, in SMEM
    # out_ref: (TM, G)   sigmoid probabilities
    x = x_ref[...]
    w = w_ref[...]
    if x.dtype != w.dtype:
        # bf16 path: feed the MXU bf16 x bf16 with f32 accumulation instead of
        # materialising a full-tile f32 upcast of x.
        w = w.astype(x.dtype)
    logits = jax.lax.dot_general(
        x, w,
        dimension_numbers=(((1,), (0,)), ((), ())),
        preferred_element_type=jnp.float32,
    )                                              # (TM, G) f32
    logits = logits + b_ref[0]
    out_ref[...] = jax.nn.sigmoid(logits).astype(out_ref.dtype)


def scorers_only_id(embedding, weight, bias):
    """embedding: [..., D]; weight: [1, D]; bias: [1]. Returns [..., 1]."""
    *lead, D = embedding.shape
    x = embedding.reshape(-1, D)
    M = x.shape[0]
    in_dtype = embedding.dtype
    itemsize = jnp.dtype(in_dtype).itemsize

    # ---- Lane packing for narrow D: G logical rows per packed row ----------
    G = max(1, 128 // D) if D < 128 else 1
    Dp = G * D                                   # packed row width
    Mp = -(-M // G)                              # packed rows needed

    # ---- VMEM-budget-driven tile size (TM packed rows per grid step) -------
    sublane = max(8, 32 // itemsize)             # 8 (f32), 16 (bf16), 32 (i8)
    in_row_vmem = _round_up(Dp, 128) * itemsize  # lane-padded input row
    out_row_vmem = 128 * itemsize                # (TM, G) pads lanes to 128
    w_vmem = 2 * _round_up(Dp, 8) * 128 * 4      # f32 weight (conservative 2x)
    total_budget = 24 * 1024 * 1024              # fits v7x 32 MiB scoped VMEM
    tm_cap = (total_budget - w_vmem) // (2 * (in_row_vmem + out_row_vmem))
    tm_cap = max(sublane, (tm_cap // sublane) * sublane)

    TM = int(min(tm_cap, _round_up(Mp, sublane)))
    # Megacore (v7x): keep >= 2 grid steps whenever there is more than one
    # minimal tile of work so the "parallel" axis shards across both TCs.
    if Mp > sublane:
        TM = int(min(TM, max(sublane, _round_up(-(-Mp // 2), sublane))))

    Mp_pad = _round_up(Mp, TM)
    M_pad = Mp_pad * G
    if M_pad != M:
        x = jnp.pad(x, ((0, M_pad - M), (0, 0)))
    xp = x.reshape(Mp_pad, Dp)                   # free row-major reshape

    # ---- Block-diagonal weight (f32, kept at full precision) ---------------
    w_vec = weight.reshape(D).astype(jnp.float32)
    if G > 1:
        eye = jnp.eye(G, dtype=jnp.float32)                      # (G, G)
        w_bd = (eye[:, None, :] * w_vec[None, :, None]).reshape(Dp, G)
    else:
        w_bd = w_vec.reshape(D, 1)
    b_arr = bias.reshape(1).astype(jnp.float32)

    cost = pl.CostEstimate(
        flops=2 * M * D,
        transcendentals=M,
        bytes_accessed=M * D * itemsize + M * itemsize + D * 4,
    )

    out = pl.pallas_call(
        scorer_kernel,
        out_shape=jax.ShapeDtypeStruct((Mp_pad, G), in_dtype),
        grid_spec=pltpu.PrefetchScalarGridSpec(
            num_scalar_prefetch=0,
            grid=(Mp_pad // TM,),
            in_specs=[
                pl.BlockSpec((TM, Dp), lambda i: (i, 0)),
                # Whole weight resident in VMEM (untiled, not double-buffered).
                pl.BlockSpec(memory_space=pltpu.MemorySpace.VMEM),
                # Scalar bias lives in SMEM (no padded VMEM tile).
                pl.BlockSpec(memory_space=pltpu.MemorySpace.SMEM),
            ],
            out_specs=pl.BlockSpec((TM, G), lambda i: (i, 0)),
        ),
        compiler_params=pltpu.CompilerParams(
            dimension_semantics=("parallel",),
            vmem_limit_bytes=32 * 1024 * 1024,
        ),
        cost_estimate=cost,
    )(xp, w_bd, b_arr)

    out = out.reshape(M_pad, 1)[:M]
    return out.reshape(tuple(lead) + (1,))


def _reference(embedding, weight, bias):
    """Pure-JAX reference mirroring nn.Linear(em_dim, 1) + Sigmoid."""
    logits = jnp.einsum("...d,od->...o", embedding.astype(jnp.float32),
                        weight.astype(jnp.float32)) + bias.astype(jnp.float32)
    return jax.nn.sigmoid(logits).astype(embedding.dtype)


if __name__ == "__main__":
    key = jax.random.PRNGKey(0)
    k_emb, k_w, k_b, k_emb2 = jax.random.split(key, 4)

    B, N, D = 2, 8, 32   # batch, num_embeddings, em_dim
    embedding = jax.random.normal(k_emb, (B, N, D), dtype=jnp.float32)
    # nn.Linear(em_dim, 1): weight [1, D], bias [1]
    weight = jax.random.normal(k_w, (1, D), dtype=jnp.float32) * 0.1
    bias = jax.random.normal(k_b, (1,), dtype=jnp.float32) * 0.1

    out = jax.block_until_ready(scorers_only_id(embedding, weight, bias))
    ref = _reference(embedding, weight, bias)
    assert out.shape == (B, N, 1), out.shape
    assert jnp.allclose(out, ref, atol=1e-5, rtol=1e-5), \
        float(jnp.max(jnp.abs(out - ref)))

    # Second check: row count not a multiple of the packing factor / tile,
    # exercising the padding + slice path.
    embedding2 = jax.random.normal(k_emb2, (3, 5, D), dtype=jnp.float32)
    out2 = jax.block_until_ready(scorers_only_id(embedding2, weight, bias))
    ref2 = _reference(embedding2, weight, bias)
    assert out2.shape == (3, 5, 1), out2.shape
    assert jnp.allclose(out2, ref2, atol=1e-5, rtol=1e-5), \
        float(jnp.max(jnp.abs(out2 - ref2)))

    print("KERNEL_OK")
</pallas_src>

<mosaic_0001>
module attributes {stable_mosaic.version = 11 : i64} {
  func.func @scorer_kernel(%arg0: i32, %arg1: memref<8x128xf32, #tpu.memory_space<vmem>>, %arg2: memref<128x4xf32, #tpu.memory_space<vmem>>, %arg3: memref<1xf32, #tpu.memory_space<smem>>, %arg4: memref<8x4xf32, #tpu.memory_space<vmem>>) attributes {dimension_semantics = [#tpu.dimension_semantics<parallel>], iteration_bounds = array<i64: 1>, scalar_prefetch = 0 : i64, scratch_operands = 0 : i64, tpu.core_type = #tpu.core_type<tc>, window_params = [{transform_indices = @transform_0, window_bounds = array<i64: 8, 128>}, {pipeline_mode = #tpu.pipeline_mode<synchronous>, transform_indices = @transform_1, window_bounds = array<i64: 128, 4>}, {transform_indices = @transform_2, window_bounds = array<i64: 1>}, {transform_indices = @transform_3, window_bounds = array<i64: 8, 4>}]} {
    %c0 = arith.constant 0 : index
    %c0_0 = arith.constant 0 : index
    %0 = vector.load %arg1[%c0, %c0_0] : memref<8x128xf32, #tpu.memory_space<vmem>>, vector<8x128xf32>
    %c0_1 = arith.constant 0 : index
    %c0_2 = arith.constant 0 : index
    %1 = vector.load %arg2[%c0_1, %c0_2] : memref<128x4xf32, #tpu.memory_space<vmem>>, vector<128x4xf32>
    %cst = arith.constant dense<0.000000e+00> : vector<8x4xf32>
    %2 = tpu.matmul %0, %1, %cst {dimension_numbers = #tpu.dot_dimension_numbers<[1], [0], [0], [1], [0, 0, 1, 1], [], []>} : vector<8x128xf32>, vector<128x4xf32>, vector<8x4xf32> -> vector<8x4xf32>
    %c0_3 = arith.constant 0 : index
    %3 = memref.load %arg3[%c0_3] : memref<1xf32, #tpu.memory_space<smem>>
    %4 = vector.broadcast %3 : f32 to vector<8x4xf32>
    %5 = arith.addf %2, %4 : vector<8x4xf32>
    %6 = arith.negf %5 : vector<8x4xf32>
    %7 = math.exp %6 : vector<8x4xf32>
    %cst_4 = arith.constant 1.000000e+00 : f32
    %8 = vector.broadcast %cst_4 : f32 to vector<8x4xf32>
    %9 = arith.addf %8, %7 : vector<8x4xf32>
    %10 = arith.divf %8, %9 : vector<8x4xf32>
    %c0_5 = arith.constant 0 : index
    %c0_6 = arith.constant 0 : index
    %11 = vector.load %arg4[%c0_5, %c0_6] : memref<8x4xf32, #tpu.memory_space<vmem>>, vector<8x4xf32>
    tpu.vector_store %arg4[%c0_5, %c0_6], %10 {strides = array<i32>} : memref<8x4xf32, #tpu.memory_space<vmem>>, vector<8x4xf32>,
    return
  }
  func.func @transform_0(%arg0: i32) -> (i32, i32) {
    %c0_i32 = arith.constant 0 : i32
    %c0_i32_0 = arith.constant 0 : i32
    return %arg0, %c0_i32 : i32, i32
  }
  func.func @transform_1(%arg0: i32) -> (i32, i32) {
    %c0_i32 = arith.constant 0 : i32
    %c0_i32_0 = arith.constant 0 : i32
    %c0_i32_1 = arith.constant 0 : i32
    return %c0_i32, %c0_i32_0 : i32, i32
  }
  func.func @transform_2(%arg0: i32) -> i32 {
    %c0_i32 = arith.constant 0 : i32
    %c0_i32_0 = arith.constant 0 : i32
    return %c0_i32 : i32
  }
  func.func @transform_3(%arg0: i32) -> (i32, i32) {
    %c0_i32 = arith.constant 0 : i32
    %c0_i32_0 = arith.constant 0 : i32
    return %arg0, %c0_i32 : i32, i32
  }
}

</mosaic_0001>

<bundles_post_ra>
// kernel: tpu_custom_call.1
= control target key start
LH: loop header
LB: loop body
LE: loop exit
PB: predicated region body
PF: predicated region fallthrough
CT: control target
= control target key end

     0   :  { %v200_v0 = vmov 0.0|0.0   ;;  %vm201_vm0 = vmmov 0   ;;  %v202_v4 = vmov 0.0   ;;  %vm110_vm1 = vcmask 31744   ;;  %s280_s1 = inlined_call_operand.vmem [shape: f32[128,4], index: 1, kind: input, shape index: {}]   ;;  %s281_s0 = inlined_call_operand.vmem [shape: f32[8,128], index: 0, kind: input, shape index: {}]   ;;  %s282_s2 = inlined_call_operand.<no memory space> [shape: f32[1], index: 2, kind: input, shape index: {}]   ;;  %s283_s3 = inlined_call_operand.vmem [shape: f32[8,4], index: 3, kind: output, shape index: {}]  }
   0x1   :  { %169 = vmatprep.subr.bf16.mxu0 %v200_v0  ;;  %v16_v1 = vld [vmem:[%s280_s1] sm:$0xff]  ;;  %v17_v2 = vld [vmem:[%s280_s1 + $0x8] sm:$0xff]  ;;  %v18_v3 = vld [vmem:[%s280_s1 + $0x10] sm:$0xff]  ;;  %166 = vmatprep.mubr.msk.f32.mxu0 %vm201_vm0, %v202_v4  ;;  %v33_v27 = vstv %s282_s2 }
   0x2   :  { %v170_v5 = vpack.c.bf16 %v17_v2, %v16_v1  ;;  %v19_v6 = vld [vmem:[%s280_s1 + $0x18] sm:$0xff]  ;;  %v20_v8 = vld [vmem:[%s280_s1 + $0x20] sm:$0xff]  ;;  %v21_v9 = vld [vmem:[%s280_s1 + $0x28] sm:$0xff] }
   0x3   :  { %v173_v7 = vpack.c.bf16 %v19_v6, %v18_v3  ;;  %v176_v10 = vpack.c.bf16 %v21_v9, %v20_v8  ;;  %v22_v11 = vld [vmem:[%s280_s1 + $0x30] sm:$0xff]  ;;  %v23_v12 = vld [vmem:[%s280_s1 + $0x38] sm:$0xff]  ;;  %v24_v14 = vld [vmem:[%s280_s1 + $0x40] sm:$0xff] }
   0x4   :  { %171 = vmatpush3.bf16.msra.mxu0 %v170_v5  ;;  %v179_v13 = vpack.c.bf16 %v23_v12, %v22_v11  ;;  %v25_v15 = vld [vmem:[%s280_s1 + $0x48] sm:$0xff]  ;;  %v26_v17 = vld [vmem:[%s280_s1 + $0x50] sm:$0xff]  ;;  %v27_v18 = vld [vmem:[%s280_s1 + $0x58] sm:$0xff] }
   0x5   :  { %172 = vmatprep.subr.bf16.mxu0 %v200_v0  ;;  %v182_v16 = vpack.c.bf16 %v25_v15, %v24_v14  ;;  %v185_v19 = vpack.c.bf16 %v27_v18, %v26_v17  ;;  %v28_v20 = vld [vmem:[%s280_s1 + $0x60] sm:$0xff]  ;;  %v29_v21 = vld [vmem:[%s280_s1 + $0x68] sm:$0xff]  ;;  %v30_v23 = vld [vmem:[%s280_s1 + $0x70] sm:$0xff] }
   0x6   :  { %v188_v22 = vpack.c.bf16 %v29_v21, %v28_v20  ;;  %v31_v24 = vld [vmem:[%s280_s1 + $0x78] sm:$0xff]  ;;  %v15_v26 = vld [vmem:[%s281_s0] sm:$0xff] }
   0x7   :  { %v191_v25 = vpack.c.bf16 %v31_v24, %v30_v23 }
   0x8   :  { %174 = vmatpush3.bf16.msra.mxu0 %v173_v7 }
   0x9   :  { %175 = vmatprep.subr.bf16.mxu0 %v200_v0 }
   0xc   :  { %177 = vmatpush3.bf16.msra.mxu0 %v176_v10 }
   0xd   :  { %178 = vmatprep.subr.bf16.mxu0 %v200_v0 }
  0x10   :  { %180 = vmatpush3.bf16.msra.mxu0 %v179_v13 }
  0x11   :  { %181 = vmatprep.subr.bf16.mxu0 %v200_v0 }
  0x14   :  { %183 = vmatpush3.bf16.msra.mxu0 %v182_v16 }
  0x15   :  { %184 = vmatprep.subr.bf16.mxu0 %v200_v0 }
  0x18   :  { %186 = vmatpush3.bf16.msra.mxu0 %v185_v19 }
  0x19   :  { %187 = vmatprep.subr.bf16.mxu0 %v200_v0 }
  0x1c   :  { %189 = vmatpush3.bf16.msra.mxu0 %v188_v22 }
  0x1d   :  { %190 = vmatprep.subr.bf16.mxu0 %v200_v0 }
  0x20   :  { %192 = vmatpush3.bf16.msra.mxu0 %v191_v25 }
  0x23   :  { %167 = vmatmul.mubr.f32.vlgmr.msra.gmra.mrb[0].mxu0 %v15_v26 }
  0xf6   :  { %v100_v28 = vpop.f32.mrb[0].mxu0 }
  0xf7   :  { %v101_v29 = vadd.f32 %v100_v28, %v33_v27  ;;  %v168_v30 = vpop.f32.mrb[1].mxu0 }
  0xf9   :  { %v116_v31 = vmul.f32 -1.442695, %v101_v29 }
  0xfb   :  { %196 = vpow2.f32 %v116_v31 }
 0x105   :  { %v197_v32 = vpop.eup %196 }
 0x106   :  { %v107_v33 = vadd.f32 1.0, %v197_v32 }
 0x108   :  { %198 = vrcp.f32 %v107_v33 }
 0x112   :  { %v199_v34 = vpop.eup %198 }
 0x113   :  { %111 = vst.msk [vmem:[%s283_s3] sm:$0xff] %vm110_vm1, %v199_v34 }

</bundles_post_ra>
